<compile_context>
chip_gen: v5e
topology: v5e:2x2
jax: 0.10.0
libtpu: 0.0.40
codegen_flags: <defaults>
</compile_context>

<pallas_src>
import jax
import jax.numpy as jnp
from jax.experimental import pallas as pl
from jax.experimental.pallas import tpu as pltpu


def _round_up(x: int, m: int) -> int:
    return ((x + m - 1) // m) * m


def _vmem_capacity_bytes(default: int = 64 * 1024 * 1024) -> int:
    """Physical VMEM of the attached TPU; conservative (v7x) default if unknown."""
    try:
        info = pltpu.get_tpu_info()
        cap = getattr(info, "vmem_capacity_bytes", None)
        if cap:
            return int(cap)
    except Exception:
        pass
    return default


# ----------------------------------------------------------------------------- kernels
def _kernel_pre(a_ref, ys_ref, xd_ref, ws_ref, b_ref, out_ref):
    """lin_before_mp path (in_feats > out_feats).

    Grid = (dst-node tile i [parallel], src-node tile j [reduction, arbitrary]).
    ys = X @ W_neigh^T was applied before aggregation, so the reduction accumulates
    directly in output space into the resident out block (no scratch needed).
    """
    j = pl.program_id(1)

    @pl.when(j == 0)
    def _init():
        # fc_self(x_dst) + bias, hoisted to the first reduction step so the pipeline
        # tail is not a serial multi-matmul chain.
        out_ref[...] = (jnp.dot(xd_ref[...], ws_ref[...],
                                preferred_element_type=jnp.float32)
                        + b_ref[...])

    # Mean aggregation on the MXU: bf16 operands, f32 accumulation.
    out_ref[...] += jnp.dot(a_ref[...], ys_ref[...],
                            preferred_element_type=jnp.float32)


def _kernel_post(a_ref, xs_ref, xd_ref, wn_ref, ws_ref, b_ref, out_ref, acc_ref):
    """mp-before-linear path (in_feats <= out_feats): aggregate raw features into an
    f32 scratch, apply fc_neigh once per dst tile on the last reduction step."""
    j = pl.program_id(1)

    @pl.when(j == 0)
    def _init():
        acc_ref[...] = jnp.zeros_like(acc_ref)
        out_ref[...] = (jnp.dot(xd_ref[...], ws_ref[...],
                                preferred_element_type=jnp.float32)
                        + b_ref[...])

    acc_ref[...] += jnp.dot(a_ref[...], xs_ref[...],
                            preferred_element_type=jnp.float32)

    @pl.when(j == pl.num_programs(1) - 1)
    def _finalize():
        out_ref[...] += jnp.dot(acc_ref[...], wn_ref[...],
                                preferred_element_type=jnp.float32)


# ----------------------------------------------------------------------------- wrapper
def noncovme_agg_layer(node_feat, src, dst, w_neigh, w_self, bias):
    """node_feat: (N, D); src/dst: (E,) int32; w_neigh/w_self: (O, D) PyTorch-style
    Linear weights (bias=False); bias: (O,).  Returns (N, O)."""
    N, D = node_feat.shape
    O = w_neigh.shape[0]
    lin_before_mp = D > O            # same test as DGL's _in_src_feats > _out_feats

    # TODO(synk): feat_drop (nn.Dropout) treated as identity (eval mode / p=0).
    # TODO(synk): edge_weight (u_mul_e) branch and DGL block-graph dst slicing omitted.

    # ---- glue (plain JAX): row-normalized dense adjacency for the mean reducer ----
    # a_mean[v, u] = (#edges u -> v) / max(in_degree(v), 1); isolated nodes stay 0,
    # matching DGL's fn.mean.
    # TODO(synk): for large *sparse* graphs replace this O(N^2) dense build + matmul
    #             with a PrefetchScalarGridSpec CSR gather / scatter-add kernel.
    f32, bf16 = jnp.float32, jnp.bfloat16
    counts = jnp.zeros((N, N), f32).at[dst, src].add(1.0)
    deg = jnp.sum(counts, axis=1, keepdims=True)
    a_mean = counts / jnp.maximum(deg, 1.0)

    # ---- lane-dense padding (last dims -> multiples of 128) ----
    d_pad = _round_up(D, 128)
    o_pad = _round_up(O, 128)
    agg_pad = o_pad if lin_before_mp else d_pad      # width of the re-streamed slab
    n_align = _round_up(N, 128)

    # ---- shape-derived tile size / VMEM budget (v5e/v6e ~100 MiB, v7x ~54 MiB) ----
    budget = min(int(0.85 * _vmem_capacity_bytes()), 100 * 1024 * 1024)

    def _footprint(tn):
        f = 2 * tn * tn * 2                                   # A tile (bf16), 2 bufs
        f += 2 * tn * agg_pad * 2                             # src slab (bf16), 2 bufs
        f += 2 * tn * d_pad * 4                               # x_dst tile (f32, revisited)
        f += 2 * (1 if lin_before_mp else 2) * d_pad * o_pad * 4   # weights (f32)
        f += 2 * 8 * o_pad * 4                                # bias
        f += 2 * tn * o_pad * 4                               # out tile (f32), 2 bufs
        if not lin_before_mp:
            f += tn * d_pad * 4                               # f32 neigh accumulator
        return f

    tn = 128
    for cand in (1024, 768, 512, 384, 256, 128):
        if cand <= n_align and _footprint(cand) <= budget:
            tn = cand
            break
    n_pad = _round_up(N, tn)
    grid = (n_pad // tn, n_pad // tn)
    # TODO(synk): single-buffer the revisited weight/bias/x_dst blocks via
    #             pipeline_mode=pl.Buffered(1) to reclaim their 2x VMEM reservation.
    # TODO(synk): optional fp8 (e4m3) adjacency operand on v7x, gated on accuracy.

    # ---- padded operands (bf16 only for the N^2-scale streams) ----
    x_f32 = node_feat.astype(f32)
    a_p = jnp.zeros((n_pad, n_pad), bf16).at[:N, :N].set(a_mean.astype(bf16))
    xd_p = jnp.zeros((n_pad, d_pad), f32).at[:N, :D].set(x_f32)
    ws_p = jnp.zeros((d_pad, o_pad), f32).at[:D, :O].set(w_self.T.astype(f32))
    b_p = jnp.zeros((1, o_pad), f32).at[0, :O].set(bias.astype(f32))

    a_spec = pl.BlockSpec((tn, tn), lambda i, j: (i, j))          # adjacency tile
    src_spec = pl.BlockSpec((tn, agg_pad), lambda i, j: (j, 0))   # streamed src slab
    xd_spec = pl.BlockSpec((tn, d_pad), lambda i, j: (i, 0))      # x (self / dst tile)
    w_spec = pl.BlockSpec((d_pad, o_pad), lambda i, j: (0, 0))    # weight (revisited)
    b_spec = pl.BlockSpec((1, o_pad), lambda i, j: (0, 0))        # bias (revisited)
    out_spec = pl.BlockSpec((tn, o_pad), lambda i, j: (i, 0))     # resident out block

    compiler_params = pltpu.CompilerParams(
        dimension_semantics=("parallel", "arbitrary"),
        vmem_limit_bytes=budget,
    )

    if lin_before_mp:
        # fc_neigh applied before aggregation (exact: linear commutes with the mean).
        y = x_f32 @ w_neigh.T.astype(f32)
        ys_p = jnp.zeros((n_pad, o_pad), bf16).at[:N, :O].set(y.astype(bf16))

        flops = 2 * n_pad * n_pad * o_pad + 2 * n_pad * d_pad * o_pad
        bytes_accessed = (n_pad * n_pad * 2                   # adjacency (bf16)
                          + grid[0] * n_pad * o_pad * 2       # Y re-read per dst tile
                          + n_pad * d_pad * 4                 # x_dst (f32)
                          + d_pad * o_pad * 4 + o_pad * 4     # W_self^T, bias
                          + n_pad * o_pad * 4)                # out

        out_p = pl.pallas_call(
            _kernel_pre,
            out_shape=jax.ShapeDtypeStruct((n_pad, o_pad), f32),
            grid_spec=pltpu.PrefetchScalarGridSpec(
                num_scalar_prefetch=0,
                grid=grid,
                in_specs=[a_spec, src_spec, xd_spec, w_spec, b_spec],
                out_specs=out_spec,
            ),
            compiler_params=compiler_params,
            cost_estimate=pl.CostEstimate(
                flops=flops, transcendentals=0, bytes_accessed=bytes_accessed),
        )(a_p, ys_p, xd_p, ws_p, b_p)
    else:
        xs_p = jnp.zeros((n_pad, d_pad), bf16).at[:N, :D].set(x_f32.astype(bf16))
        wn_p = jnp.zeros((d_pad, o_pad), f32).at[:D, :O].set(w_neigh.T.astype(f32))

        flops = 2 * n_pad * n_pad * d_pad + 4 * n_pad * d_pad * o_pad
        bytes_accessed = (n_pad * n_pad * 2
                          + grid[0] * n_pad * d_pad * 2       # X re-read per dst tile
                          + n_pad * d_pad * 4
                          + 2 * d_pad * o_pad * 4 + o_pad * 4
                          + n_pad * o_pad * 4)

        out_p = pl.pallas_call(
            _kernel_post,
            out_shape=jax.ShapeDtypeStruct((n_pad, o_pad), f32),
            grid_spec=pltpu.PrefetchScalarGridSpec(
                num_scalar_prefetch=0,
                grid=grid,
                in_specs=[a_spec, src_spec, xd_spec, w_spec, w_spec, b_spec],
                out_specs=out_spec,
                scratch_shapes=[pltpu.VMEM((tn, d_pad), f32)],  # f32 neigh accumulator
            ),
            compiler_params=compiler_params,
            cost_estimate=pl.CostEstimate(
                flops=flops, transcendentals=0, bytes_accessed=bytes_accessed),
        )(a_p, xs_p, xd_p, wn_p, ws_p, b_p)

    return out_p[:N, :O].astype(node_feat.dtype)


# ----------------------------------------------------------------------------- reference
def _reference(node_feat, src, dst, w_neigh, w_self, bias):
    """Pure-JAX reference matching the PyTorch/DGL forward."""
    N = node_feat.shape[0]
    msg = node_feat[src]                                              # fn.copy_u
    s = jax.ops.segment_sum(msg, dst, num_segments=N)
    deg = jax.ops.segment_sum(jnp.ones((src.shape[0],), jnp.float32),
                              dst, num_segments=N)
    neigh = s / jnp.maximum(deg, 1.0)[:, None]                        # fn.mean
    return node_feat @ w_self.T + neigh @ w_neigh.T + bias


if __name__ == "__main__":
    N, E = 16, 32                      # nodes, edges

    def _run_case(key, D, O):
        k1, k2, k3, k4, k5, k6 = jax.random.split(key, 6)
        node_feat = jax.random.normal(k1, (N, D), dtype=jnp.float32)
        src = jax.random.randint(k2, (E,), 0, N, dtype=jnp.int32)
        dst = jax.random.randint(k3, (E,), 0, N, dtype=jnp.int32)

        # Xavier-uniform init with gain sqrt(2), matching reset_parameters().
        gain = 2.0 ** 0.5
        lim = gain * (6.0 / (D + O)) ** 0.5
        w_neigh = jax.random.uniform(k4, (O, D), jnp.float32, -lim, lim)
        w_self = jax.random.uniform(k5, (O, D), jnp.float32, -lim, lim)
        bias = jax.random.normal(k6, (O,), dtype=jnp.float32) * 0.1

        out = jax.block_until_ready(
            noncovme_agg_layer(node_feat, src, dst, w_neigh, w_self, bias))
        ref = _reference(node_feat, src, dst, w_neigh, w_self, bias)
        assert out.shape == (N, O)
        err = float(jnp.max(jnp.abs(out - ref)))
        # bf16 operands on the aggregation stream -> bf16-level tolerance.
        assert jnp.allclose(out, ref, atol=5e-2, rtol=5e-2), \
            f"mismatch vs reference (D={D}, O={O}): max abs err {err}"

    key = jax.random.PRNGKey(0)
    k_pre, k_post = jax.random.split(key)
    _run_case(k_pre, D=32, O=16)       # lin_before_mp path (in_feats > out_feats)
    _run_case(k_post, D=16, O=32)      # mp-before-linear path (in_feats <= out_feats)
    print("KERNEL_OK")
</pallas_src>

<mosaic_0001>
module attributes {stable_mosaic.version = 11 : i64} {
  func.func @_kernel_pre(%arg0: i32, %arg1: i32, %arg2: memref<128x128xbf16, #tpu.memory_space<vmem>>, %arg3: memref<128x128xbf16, #tpu.memory_space<vmem>>, %arg4: memref<128x128xf32, #tpu.memory_space<vmem>>, %arg5: memref<128x128xf32, #tpu.memory_space<vmem>>, %arg6: memref<1x128xf32, #tpu.memory_space<vmem>>, %arg7: memref<128x128xf32, #tpu.memory_space<vmem>>) attributes {dimension_semantics = [#tpu.dimension_semantics<parallel>, #tpu.dimension_semantics<arbitrary>], iteration_bounds = array<i64: 1, 1>, scalar_prefetch = 0 : i64, scratch_operands = 0 : i64, tpu.core_type = #tpu.core_type<tc>, window_params = [{transform_indices = @transform_0, window_bounds = array<i64: 128, 128>}, {transform_indices = @transform_1, window_bounds = array<i64: 128, 128>}, {transform_indices = @transform_2, window_bounds = array<i64: 128, 128>}, {pipeline_mode = #tpu.pipeline_mode<synchronous>, transform_indices = @transform_3, window_bounds = array<i64: 128, 128>}, {pipeline_mode = #tpu.pipeline_mode<synchronous>, transform_indices = @transform_4, window_bounds = array<i64: 1, 128>}, {transform_indices = @transform_5, window_bounds = array<i64: 128, 128>}]} {
    %c0_i32 = arith.constant 0 : i32
    %0 = arith.cmpi eq, %arg1, %c0_i32 : i32
    %1 = arith.extui %0 : i1 to i32
    %c0_i32_0 = arith.constant 0 : i32
    %2 = arith.cmpi ne, %1, %c0_i32_0 : i32
    scf.if %2 {
      %c0_8 = arith.constant 0 : index
      %c0_9 = arith.constant 0 : index
      %9 = vector.load %arg4[%c0_8, %c0_9] : memref<128x128xf32, #tpu.memory_space<vmem>>, vector<128x128xf32>
      %c0_10 = arith.constant 0 : index
      %c0_11 = arith.constant 0 : index
      %10 = vector.load %arg5[%c0_10, %c0_11] : memref<128x128xf32, #tpu.memory_space<vmem>>, vector<128x128xf32>
      %cst_12 = arith.constant dense<0.000000e+00> : vector<128x128xf32>
      %11 = tpu.matmul %9, %10, %cst_12 {dimension_numbers = #tpu.dot_dimension_numbers<[1], [0], [0], [1], [0, 0, 1, 1], [], []>} : vector<128x128xf32>, vector<128x128xf32>, vector<128x128xf32> -> vector<128x128xf32>
      %c0_13 = arith.constant 0 : index
      %c0_14 = arith.constant 0 : index
      %12 = vector.load %arg6[%c0_13, %c0_14] : memref<1x128xf32, #tpu.memory_space<vmem>>, vector<1x128xf32>
      %13 = vector.broadcast %12 : vector<1x128xf32> to vector<128x128xf32>
      %14 = arith.addf %11, %13 : vector<128x128xf32>
      %c0_15 = arith.constant 0 : index
      %c0_16 = arith.constant 0 : index
      %15 = vector.load %arg7[%c0_15, %c0_16] : memref<128x128xf32, #tpu.memory_space<vmem>>, vector<128x128xf32>
      tpu.vector_store %arg7[%c0_15, %c0_16], %14 {strides = array<i32>} : memref<128x128xf32, #tpu.memory_space<vmem>>, vector<128x128xf32>,
    } else {
    }
    %c0 = arith.constant 0 : index
    %c0_1 = arith.constant 0 : index
    %3 = vector.load %arg7[%c0, %c0_1] : memref<128x128xf32, #tpu.memory_space<vmem>>, vector<128x128xf32>
    %c0_2 = arith.constant 0 : index
    %c0_3 = arith.constant 0 : index
    %4 = vector.load %arg2[%c0_2, %c0_3] : memref<128x128xbf16, #tpu.memory_space<vmem>>, vector<128x128xbf16>
    %c0_4 = arith.constant 0 : index
    %c0_5 = arith.constant 0 : index
    %5 = vector.load %arg3[%c0_4, %c0_5] : memref<128x128xbf16, #tpu.memory_space<vmem>>, vector<128x128xbf16>
    %cst = arith.constant dense<0.000000e+00> : vector<128x128xf32>
    %6 = tpu.matmul %4, %5, %cst {dimension_numbers = #tpu.dot_dimension_numbers<[1], [0], [0], [1], [0, 0, 1, 1], [], []>} : vector<128x128xbf16>, vector<128x128xbf16>, vector<128x128xf32> -> vector<128x128xf32>
    %7 = arith.addf %3, %6 : vector<128x128xf32>
    %c0_6 = arith.constant 0 : index
    %c0_7 = arith.constant 0 : index
    %8 = vector.load %arg7[%c0_6, %c0_7] : memref<128x128xf32, #tpu.memory_space<vmem>>, vector<128x128xf32>
    tpu.vector_store %arg7[%c0_6, %c0_7], %7 {strides = array<i32>} : memref<128x128xf32, #tpu.memory_space<vmem>>, vector<128x128xf32>,
    return
  }
  func.func @transform_0(%arg0: i32, %arg1: i32) -> (i32, i32) {
    %c0_i32 = arith.constant 0 : i32
    return %arg0, %arg1 : i32, i32
  }
  func.func @transform_1(%arg0: i32, %arg1: i32) -> (i32, i32) {
    %c0_i32 = arith.constant 0 : i32
    %c0_i32_0 = arith.constant 0 : i32
    return %arg1, %c0_i32 : i32, i32
  }
  func.func @transform_2(%arg0: i32, %arg1: i32) -> (i32, i32) {
    %c0_i32 = arith.constant 0 : i32
    %c0_i32_0 = arith.constant 0 : i32
    return %arg0, %c0_i32 : i32, i32
  }
  func.func @transform_3(%arg0: i32, %arg1: i32) -> (i32, i32) {
    %c0_i32 = arith.constant 0 : i32
    %c0_i32_0 = arith.constant 0 : i32
    %c0_i32_1 = arith.constant 0 : i32
    return %c0_i32, %c0_i32_0 : i32, i32
  }
  func.func @transform_4(%arg0: i32, %arg1: i32) -> (i32, i32) {
    %c0_i32 = arith.constant 0 : i32
    %c0_i32_0 = arith.constant 0 : i32
    %c0_i32_1 = arith.constant 0 : i32
    return %c0_i32, %c0_i32_0 : i32, i32
  }
  func.func @transform_5(%arg0: i32, %arg1: i32) -> (i32, i32) {
    %c0_i32 = arith.constant 0 : i32
    %c0_i32_0 = arith.constant 0 : i32
    return %arg0, %c0_i32 : i32, i32
  }
}

</mosaic_0001>

<bundles_post_ra>
// kernel: tpu_custom_call.1
= control target key start
LH: loop header
LB: loop body
LE: loop exit
PB: predicated region body
PF: predicated region fallthrough
CT: control target
= control target key end

     0   :  { %10 = vsyncpa [#allocation3], 0  ;;  %s777_s0 = inlined_call_operand.hbm [shape: bf16[128,128], index: 0, kind: input, shape index: {}]   ;;  %s778_s1 = inlined_call_operand.hbm [shape: bf16[128,128], index: 1, kind: input, shape index: {}]   ;;  %s779_s2 = inlined_call_operand.hbm [shape: f32[128,128], index: 2, kind: input, shape index: {}]   ;;  %s780_s3 = inlined_call_operand.hbm [shape: f32[128,128], index: 3, kind: input, shape index: {}]   ;;  %s781_s4 = inlined_call_operand.vmem [shape: f32[1,128], index: 4, kind: input, shape index: {}]   ;;  %s782_s5 = inlined_call_operand.hbm [shape: f32[128,128], index: 5, kind: output, shape index: {}]  }
   0x1   :  { %11 = vsyncpa [#allocation6], 0 }
   0x2   :  { %12 = vsyncpa [#allocation9], 0 }
   0x3   :  { %13 = vsyncpa [#allocation4], 0  ;;  %s31_s20 = sshll.u32 %s778_s1, 4  ;;  %s693_s21 = smov [#allocation5]   ;;  %s32_s20 = int_to_ptr.hbm [resolvable:$true] %s31_s20 }
   0x4   :  { %s33_s22 = sshll.u32 %s693_s21, 4  ;;  %s18_s25 = sshll.u32 %s777_s0, 4  ;;  %s34_s22 = int_to_ptr.vmem [resolvable:$true] %s33_s22  ;;  %s19_s25 = int_to_ptr.hbm [resolvable:$true] %s18_s25 }
   0x5   :  { %s694_s26 = smov 64   ;;  %s695_s27 = smov 4  }
   0x6   :  { %39 = dma.hbm_to_vmem [thread:$0]  %s32_s20, 1024, %s34_s22, [#allocation6], %s694_s26, %s694_s26, %s695_s27  }
   0x7   :  { %s696_s28 = smov [#allocation2]   ;;  %s44_s7 = sshll.u32 %s779_s2, 4  ;;  %s45_s7 = int_to_ptr.hbm [resolvable:$true] %s44_s7 }
   0x8   :  { %s20_s29 = sshll.u32 %s696_s28, 4  ;;  %s697_s1 = smov [#allocation7]   ;;  %s21_s29 = int_to_ptr.vmem [resolvable:$true] %s20_s29 }
   0x9   :  { %26 = dma.hbm_to_vmem [thread:$0]  %s19_s25, 1024, %s21_s29, [#allocation3], %s694_s26, %s694_s26, %s695_s27  }
   0xa   :  { %s46_s8 = sshll.u32 %s697_s1, 4  ;;  %s57_s0 = sshll.u32 %s780_s3, 4  ;;  %s47_s8 = int_to_ptr.vmem [resolvable:$true] %s46_s8  ;;  %s58_s0 = int_to_ptr.hbm [resolvable:$true] %s57_s0 }
   0xb   :  { %s698_s11 = smov 128   ;;  %s699_s12 = smov 8  }
   0xc   :  { %52 = dma.hbm_to_vmem [thread:$0]  %s45_s7, 2048, %s47_s8, [#allocation6], %s698_s11, %s698_s11, %s699_s12  }
   0xd   :  { %s700_s13 = smov [#allocation8]  }
   0xe   :  { %s59_s14 = sshll.u32 %s700_s13, 4  ;;  %s60_s14 = int_to_ptr.vmem [resolvable:$true] %s59_s14 }
   0xf   :  { %65 = dma.hbm_to_vmem [thread:$0]  %s58_s0, 2048, %s60_s14, [#allocation9], %s698_s11, %s698_s11, %s699_s12  }
  0x10   :  { %685 = dma.done.wait [#allocation3], 1024  }
  0x11   :  { %686 = vsyncadd [#allocation3], 4294966272 }
  0x12   :  { %687 = dma.done.wait [#allocation6], 3072  }
  0x13   :  { %688 = vsyncadd [#allocation6], 4294964224 }
  0x14   :  { %689 = dma.done.wait [#allocation9], 2048  }
  0x15   :  { %690 = vsyncadd [#allocation9], 4294965248  ;;  %v119_v0 = vld [vmem:[#allocation8 + $0x78] sm:$0xff]  ;;  %v118_v1 = vld [vmem:[#allocation8 + $0x70] sm:$0xff]  ;;  %s436_s18 = sshll.u32 %s782_s5, 4  ;;  %s437_s18 = int_to_ptr.hbm [resolvable:$true] %s436_s18 }
  0x16   :  { %v530_v2 = vld [vmem:[#allocation5 + $0x38] sm:$0xff]  ;;  %124 = vmatpush.msra.mxu0 %v119_v0  ;;  %531 = vmatpush.msra.mxu2 %v119_v0  ;;  %v117_v3 = vld [vmem:[#allocation8 + $0x68] sm:$0xff]  ;;  %v529_v4 = vld [vmem:[#allocation5 + $0x30] sm:$0xff] }
  0x17   :  { %547 = vmatpush.bf16.msra.mxu3 %v530_v2  ;;  %349 = vmatpush.bf16.msra.mxu1 %v530_v2  ;;  %v116_v5 = vld [vmem:[#allocation8 + $0x60] sm:$0xff]  ;;  %v115_v6 = vld [vmem:[#allocation8 + $0x58] sm:$0xff]  ;;  %v528_v7 = vld [vmem:[#allocation5 + $0x28] sm:$0xff] }
  0x18   :  { %125 = vmatpush.msra.mxu0 %v118_v1  ;;  %532 = vmatpush.msra.mxu2 %v118_v1  ;;  %v114_v8 = vld [vmem:[#allocation8 + $0x50] sm:$0xff]  ;;  %v113_v9 = vld [vmem:[#allocation8 + $0x48] sm:$0xff]  ;;  %v527_v10 = vld [vmem:[#allocation5 + $0x20] sm:$0xff] }
  0x19   :  { %v112_v11 = vld [vmem:[#allocation8 + $0x40] sm:$0xff]  ;;  %v111_v12 = vld [vmem:[#allocation8 + $0x38] sm:$0xff]  ;;  %v110_v14 = vld [vmem:[#allocation8 + $0x30] sm:$0xff] }
  0x1a   :  { %126 = vmatpush.msra.mxu0 %v117_v3  ;;  %533 = vmatpush.msra.mxu2 %v117_v3  ;;  %v526_v13 = vld [vmem:[#allocation5 + $0x18] sm:$0xff]  ;;  %v109_v15 = vld [vmem:[#allocation8 + $0x28] sm:$0xff]  ;;  %v525_v16 = vld [vmem:[#allocation5 + $0x10] sm:$0xff] }
  0x1b   :  { %548 = vmatpush.bf16.msra.mxu3 %v529_v4  ;;  %350 = vmatpush.bf16.msra.mxu1 %v529_v4  ;;  %v108_v17 = vld [vmem:[#allocation8 + $0x20] sm:$0xff]  ;;  %v107_v18 = vld [vmem:[#allocation8 + $0x18] sm:$0xff]  ;;  %v524_v19 = vld [vmem:[#allocation5 + $0x8] sm:$0xff] }
  0x1c   :  { %127 = vmatpush.msra.mxu0 %v116_v5  ;;  %534 = vmatpush.msra.mxu2 %v116_v5  ;;  %v106_v20 = vld [vmem:[#allocation8 + $0x10] sm:$0xff]  ;;  %v105_v21 = vld [vmem:[#allocation8 + $0x8] sm:$0xff]  ;;  %v523_v22 = vld [vmem:[#allocation5] sm:$0xff] }
  0x1d   :  { %v104_v23 = vld [vmem:[#allocation8] sm:$0xff]  ;;  %v89_v28 = vld [vmem:[#allocation7 + $0x8] sm:$0xff]  ;;  %v90_v30 = vld [vmem:[#allocation7 + $0x10] sm:$0xff] }
  0x1e   :  { %128 = vmatpush.msra.mxu0 %v115_v6  ;;  %535 = vmatpush.msra.mxu2 %v115_v6  ;;  %v88_v24 = vld [vmem:[#allocation7] sm:$0xff]  ;;  %v97_v29 = vld [vmem:[#allocation7 + $0x48] sm:$0xff]  ;;  %v98_v31 = vld [vmem:[#allocation7 + $0x50] sm:$0xff] }
  0x1f   :  { %549 = vmatpush.bf16.msra.mxu3 %v528_v7  ;;  %351 = vmatpush.bf16.msra.mxu1 %v528_v7  ;;  %v96_v25 = vld [vmem:[#allocation7 + $0x40] sm:$0xff]  ;;  %v520_v32 = vld [vmem:[#allocation2 + $0x28] sm:$0xff]  ;;  %v91_v34 = vld [vmem:[#allocation7 + $0x18] sm:$0xff] }
  0x20   :  { %129 = vmatpush.msra.mxu0 %v114_v8  ;;  %536 = vmatpush.msra.mxu2 %v114_v8  ;;  %v519_v26 = vld [vmem:[#allocation2 + $0x20] sm:$0xff]  ;;  %v516_v33 = vld [vmem:[#allocation2 + $0x8] sm:$0xff]  ;;  %v99_v35 = vld [vmem:[#allocation7 + $0x58] sm:$0xff] }
  0x21   :  { %v515_v27 = vld [vmem:[#allocation2] sm:$0xff]  ;;  %v521_v38 = vld [vmem:[#allocation2 + $0x30] sm:$0xff]  ;;  %v93_v40 = vld [vmem:[#allocation7 + $0x28] sm:$0xff] }
  0x22   :  { %130 = vmatpush.msra.mxu0 %v113_v9  ;;  %537 = vmatpush.msra.mxu2 %v113_v9  ;;  %v92_v36 = vld [vmem:[#allocation7 + $0x20] sm:$0xff]  ;;  %v517_v39 = vld [vmem:[#allocation2 + $0x10] sm:$0xff]  ;;  %v101_v41 = vld [vmem:[#allocation7 + $0x68] sm:$0xff] }
  0x23   :  { %550 = vmatpush.bf16.msra.mxu3 %v527_v10  ;;  %352 = vmatpush.bf16.msra.mxu1 %v527_v10  ;;  %v100_v37 = vld [vmem:[#allocation7 + $0x60] sm:$0xff]  ;;  %v94_v42 = vld [vmem:[#allocation7 + $0x30] sm:$0xff]  ;;  %v522_v44 = vld [vmem:[#allocation2 + $0x38] sm:$0xff] }
  0x24   :  { %131 = vmatpush.msra.mxu0 %v112_v11  ;;  %538 = vmatpush.msra.mxu2 %v112_v11  ;;  %v102_v43 = vld [vmem:[#allocation7 + $0x70] sm:$0xff]  ;;  %v518_v45 = vld [vmem:[#allocation2 + $0x18] sm:$0xff]  ;;  %v753_v48 = vld [vmem:[%s781_s4] ss:$0 sm:$0xff]  ;;  %s701_s4 = smov [#allocation10]  }
  0x25   :  { %v95_v46 = vld [vmem:[#allocation7 + $0x38] sm:$0xff]  ;;  %s434_s15 = sshll.u32 %s701_s4, 4  ;;  %s435_s15 = int_to_ptr.vmem [resolvable:$true] %s434_s15 }
  0x26   :  { %132 = vmatpush.msra.mxu0 %v111_v12  ;;  %539 = vmatpush.msra.mxu2 %v111_v12  ;;  %v103_v47 = vld [vmem:[#allocation7 + $0x78] sm:$0xff] }
  0x27   :  { %551 = vmatpush.bf16.msra.mxu3 %v526_v13  ;;  %353 = vmatpush.bf16.msra.mxu1 %v526_v13 }
  0x28   :  { %133 = vmatpush.msra.mxu0 %v110_v14  ;;  %540 = vmatpush.msra.mxu2 %v110_v14 }
  0x2a   :  { %134 = vmatpush.msra.mxu0 %v109_v15  ;;  %541 = vmatpush.msra.mxu2 %v109_v15 }
  0x2b   :  { %552 = vmatpush.bf16.msra.mxu3 %v525_v16  ;;  %354 = vmatpush.bf16.msra.mxu1 %v525_v16 }
  0x2c   :  { %135 = vmatpush.msra.mxu0 %v108_v17  ;;  %542 = vmatpush.msra.mxu2 %v108_v17 }
  0x2e   :  { %136 = vmatpush.msra.mxu0 %v107_v18  ;;  %543 = vmatpush.msra.mxu2 %v107_v18 }
  0x2f   :  { %553 = vmatpush.bf16.msra.mxu3 %v524_v19  ;;  %355 = vmatpush.bf16.msra.mxu1 %v524_v19 }
  0x30   :  { %137 = vmatpush.msra.mxu0 %v106_v20  ;;  %544 = vmatpush.msra.mxu2 %v106_v20 }
  0x32   :  { %138 = vmatpush.msra.mxu0 %v105_v21  ;;  %545 = vmatpush.msra.mxu2 %v105_v21 }
  0x33   :  { %554 = vmatpush.bf16.msra.mxu3 %v523_v22  ;;  %356 = vmatpush.bf16.msra.mxu1 %v523_v22 }
  0x34   :  { %139 = vmatpush.msra.mxu0 %v104_v23  ;;  %546 = vmatpush.msra.mxu2 %v104_v23 }
  0x35   :  { %140 = vmatmul.f32.vlgmr.msra.gmra.mxu0 %v88_v24  ;;  %164 = vmatmul.f32.vlgmr.msra.gmra.mxu2 %v96_v25 }
  0x36   :  { %377 = vmatmul.bf16.vlgmr.msra.gmra.mxu3 %v519_v26  ;;  %357 = vmatmul.bf16.vlgmr.msra.gmra.mxu1 %v515_v27 }
  0x3d   :  { %143 = vmatmul.f32.gmra.mxu0 %v89_v28  ;;  %167 = vmatmul.f32.gmra.mxu2 %v97_v29 }
  0x45   :  { %146 = vmatmul.f32.gmra.mxu0 %v90_v30  ;;  %170 = vmatmul.f32.gmra.mxu2 %v98_v31 }
  0x46   :  { %382 = vmatmul.bf16.gmra.mxu3 %v520_v32  ;;  %362 = vmatmul.bf16.gmra.mxu1 %v516_v33 }
  0x4d   :  { %149 = vmatmul.f32.gmra.mxu0 %v91_v34  ;;  %173 = vmatmul.f32.gmra.mxu2 %v99_v35 }
  0x55   :  { %152 = vmatmul.f32.gmra.mxu0 %v92_v36  ;;  %176 = vmatmul.f32.gmra.mxu2 %v100_v37 }
  0x56   :  { %387 = vmatmul.bf16.gmra.mxu3 %v521_v38  ;;  %367 = vmatmul.bf16.gmra.mxu1 %v517_v39 }
  0x5d   :  { %155 = vmatmul.f32.gmra.mxu0 %v93_v40  ;;  %179 = vmatmul.f32.gmra.mxu2 %v101_v41 }
  0x65   :  { %158 = vmatmul.f32.gmra.mxu0 %v94_v42  ;;  %182 = vmatmul.f32.gmra.mxu2 %v102_v43 }
  0x66   :  { %392 = vmatmul.bf16.gmra.mxu3 %v522_v44  ;;  %372 = vmatmul.bf16.gmra.mxu1 %v518_v45 }
  0x6d   :  { %161 = vmatmul.f32.gmra.mxu0 %v95_v46  ;;  %185 = vmatmul.f32.gmra.mxu2 %v103_v47 }
  0xb2   :  { %v141_v49 = vpop.f32.mrf.mxu0 }
  0xb3   :  { %v142_v50 = vadd.f32 %v753_v48, %v141_v49  ;;  %v358_v51 = vpop.f32.mrf.mxu1 }
  0xb5   :  { %v398_v52 = vadd.f32 %v358_v51, %v142_v50 }
  0xb7   :  { %414 = vst [vmem:[#allocation10] sm:$0xff] %v398_v52 }
  0xb8   :  { %v165_v53 = vpop.f32.mrf.mxu2 }
  0xb9   :  { %v166_v54 = vadd.f32 %v753_v48, %v165_v53  ;;  %v378_v55 = vpop.f32.mrf.mxu3 }
  0xba   :  { %v144_v56 = vpop.f32.mrf.mxu0 }
  0xbb   :  { %v145_v57 = vadd.f32 %v753_v48, %v144_v56  ;;  %v406_v58 = vadd.f32 %v378_v55, %v166_v54  ;;  %v360_v59 = vpop.f32.mrf.mxu1 }
  0xbd   :  { %422 = vst [vmem:[#allocation10 + $0x40] sm:$0xff] %v406_v58  ;;  %v399_v60 = vadd.f32 %v360_v59, %v145_v57 }
  0xbf   :  { %415 = vst [vmem:[#allocation10 + $0x8] sm:$0xff] %v399_v60 }
  0xc0   :  { %v168_v61 = vpop.f32.mrf.mxu2 }
  0xc1   :  { %v169_v62 = vadd.f32 %v753_v48, %v168_v61  ;;  %v380_v63 = vpop.f32.mrf.mxu3 }
  0xc2   :  { %v147_v0 = vpop.f32.mrf.mxu0 }
  0xc3   :  { %v148_v1 = vadd.f32 %v753_v48, %v147_v0  ;;  %v407_v2 = vadd.f32 %v380_v63, %v169_v62  ;;  %v363_v3 = vpop.f32.mrf.mxu1 }
  0xc5   :  { %423 = vst [vmem:[#allocation10 + $0x48] sm:$0xff] %v407_v2  ;;  %v400_v4 = vadd.f32 %v363_v3, %v148_v1 }
  0xc7   :  { %416 = vst [vmem:[#allocation10 + $0x10] sm:$0xff] %v400_v4 }
  0xc8   :  { %v171_v5 = vpop.f32.mrf.mxu2 }
  0xc9   :  { %v172_v6 = vadd.f32 %v753_v48, %v171_v5  ;;  %v383_v7 = vpop.f32.mrf.mxu3 }
  0xca   :  { %v150_v8 = vpop.f32.mrf.mxu0 }
  0xcb   :  { %v151_v9 = vadd.f32 %v753_v48, %v150_v8  ;;  %v408_v10 = vadd.f32 %v383_v7, %v172_v6  ;;  %v365_v11 = vpop.f32.mrf.mxu1 }
  0xcd   :  { %424 = vst [vmem:[#allocation10 + $0x50] sm:$0xff] %v408_v10  ;;  %v401_v12 = vadd.f32 %v365_v11, %v151_v9 }
  0xcf   :  { %417 = vst [vmem:[#allocation10 + $0x18] sm:$0xff] %v401_v12 }
  0xd0   :  { %v174_v13 = vpop.f32.mrf.mxu2 }
  0xd1   :  { %v175_v14 = vadd.f32 %v753_v48, %v174_v13  ;;  %v385_v15 = vpop.f32.mrf.mxu3 }
  0xd2   :  { %v153_v16 = vpop.f32.mrf.mxu0 }
  0xd3   :  { %v154_v17 = vadd.f32 %v753_v48, %v153_v16  ;;  %v409_v18 = vadd.f32 %v385_v15, %v175_v14  ;;  %v368_v19 = vpop.f32.mrf.mxu1 }
  0xd5   :  { %425 = vst [vmem:[#allocation10 + $0x58] sm:$0xff] %v409_v18  ;;  %v402_v20 = vadd.f32 %v368_v19, %v154_v17 }
  0xd7   :  { %418 = vst [vmem:[#allocation10 + $0x20] sm:$0xff] %v402_v20 }
  0xd8   :  { %v177_v21 = vpop.f32.mrf.mxu2 }
  0xd9   :  { %v178_v22 = vadd.f32 %v753_v48, %v177_v21  ;;  %v388_v23 = vpop.f32.mrf.mxu3 }
  0xda   :  { %v156_v24 = vpop.f32.mrf.mxu0 }
  0xdb   :  { %v157_v25 = vadd.f32 %v753_v48, %v156_v24  ;;  %v410_v26 = vadd.f32 %v388_v23, %v178_v22  ;;  %v370_v27 = vpop.f32.mrf.mxu1 }
  0xdd   :  { %426 = vst [vmem:[#allocation10 + $0x60] sm:$0xff] %v410_v26  ;;  %v403_v28 = vadd.f32 %v370_v27, %v157_v25 }
  0xdf   :  { %419 = vst [vmem:[#allocation10 + $0x28] sm:$0xff] %v403_v28 }
  0xe0   :  { %v180_v29 = vpop.f32.mrf.mxu2 }
  0xe1   :  { %v181_v30 = vadd.f32 %v753_v48, %v180_v29  ;;  %v390_v31 = vpop.f32.mrf.mxu3 }
  0xe2   :  { %v159_v32 = vpop.f32.mrf.mxu0 }
  0xe3   :  { %v160_v33 = vadd.f32 %v753_v48, %v159_v32  ;;  %v411_v34 = vadd.f32 %v390_v31, %v181_v30  ;;  %v373_v35 = vpop.f32.mrf.mxu1 }
  0xe5   :  { %427 = vst [vmem:[#allocation10 + $0x68] sm:$0xff] %v411_v34  ;;  %v404_v36 = vadd.f32 %v373_v35, %v160_v33 }
  0xe7   :  { %420 = vst [vmem:[#allocation10 + $0x30] sm:$0xff] %v404_v36 }
  0xe8   :  { %v183_v37 = vpop.f32.mrf.mxu2 }
  0xe9   :  { %v184_v38 = vadd.f32 %v753_v48, %v183_v37  ;;  %v393_v39 = vpop.f32.mrf.mxu3 }
  0xea   :  { %v162_v40 = vpop.f32.mrf.mxu0 }
  0xeb   :  { %v163_v41 = vadd.f32 %v753_v48, %v162_v40  ;;  %v412_v42 = vadd.f32 %v393_v39, %v184_v38  ;;  %v375_v43 = vpop.f32.mrf.mxu1 }
  0xed   :  { %428 = vst [vmem:[#allocation10 + $0x70] sm:$0xff] %v412_v42  ;;  %v405_v44 = vadd.f32 %v375_v43, %v163_v41 }
  0xef   :  { %421 = vst [vmem:[#allocation10 + $0x38] sm:$0xff] %v405_v44 }
  0xf0   :  { %v186_v45 = vpop.f32.mrf.mxu2 }
  0xf1   :  { %v187_v46 = vadd.f32 %v753_v48, %v186_v45  ;;  %v395_v47 = vpop.f32.mrf.mxu3 }
  0xf3   :  { %v413_v49 = vadd.f32 %v395_v47, %v187_v46 }
  0xf5   :  { %429 = vst [vmem:[#allocation10 + $0x78] sm:$0xff] %v413_v49 }
  0xf6   :  { %442 = dma.vmem_to_hbm [thread:$0]  %s435_s15, 2048, %s437_s18, [#allocation4], %s698_s11, %s698_s11, %s699_s12  }
  0xf7   :  { %691 = dma.done.wait [#allocation4], 2048  }
  0xf8   :  { %692 = vsyncadd [#allocation4], 4294965248 }
  0xf9   :  { %447 = vsyncpa [#allocation3], 1 }
  0xfa   :  { %448 = vsyncpa [#allocation6], 1 }
  0xfb   :  { %449 = vsyncpa [#allocation9], 1 }
  0xfc   :  { %450 = vsyncpa [#allocation4], 1 }

</bundles_post_ra>
